<compile_context>
chip_gen: v5e
topology: v5e:2x2
jax: 0.10.0
libtpu: 0.0.40
codegen_flags: <defaults>
</compile_context>

<pallas_src>
import math

import jax
import jax.numpy as jnp
from jax.experimental import pallas as pl
from jax.experimental.pallas import tpu as pltpu

_LANE = 128
_SUBLANE = 8
_BF16_PACK = 16   # bf16 sublane packing


def _round_up(n, m):
    return ((n + m - 1) // m) * m


def _nbytes(a):
    return a.size * a.dtype.itemsize


# ---------------------------------------------------------------------------
# Fused kernel: whole MLP (matmuls + bias + ReLU + split-weight skip) per tile.
# ---------------------------------------------------------------------------
def _make_fused_mlp_kernel(n_layers, input_skips, has_z, has_wstack, has_wz):
    skips = tuple(sorted(set(input_skips)))

    def kernel(*refs):
        o_ref = refs[-1]
        it = iter(refs[:-1])
        x_ref = next(it)
        z_ref = next(it) if has_z else None
        w0_ref = next(it)
        wstack_ref = next(it) if has_wstack else None
        wz_ref = next(it) if has_wz else None
        b_ref = next(it)

        # MXU inputs in bf16, accumulate in f32.
        y_b = x_ref[...].astype(jnp.bfloat16)                     # (tr, dx)
        z_b = z_ref[...].astype(jnp.bfloat16) if has_z else None  # (tr, dz)

        wz_idx = 0
        y_f32 = None
        for li in range(n_layers):                 # static unroll over layers
            if li == 0:
                acc = jnp.dot(y_b, w0_ref[...],
                              preferred_element_type=jnp.float32)
            else:
                wh = wstack_ref[li - 1]            # (h, h) bf16, static index
                acc = jnp.dot(y_b, wh, preferred_element_type=jnp.float32)
                if li in skips:
                    wz = wz_ref[wz_idx]            # (dz, h) bf16, static index
                    wz_idx += 1
                    acc = acc + jnp.dot(z_b, wz,
                                        preferred_element_type=jnp.float32)
            # bias + ReLU stay in-kernel (VPU filler hidden under the MXU).
            y_f32 = jnp.maximum(acc + b_ref[li], 0.0)
            if li + 1 < n_layers:
                y_b = y_f32.astype(jnp.bfloat16)
        o_ref[...] = y_f32.astype(o_ref.dtype)

    return kernel


# ---------------------------------------------------------------------------
# Parameter construction (mirrors torch __init__ shapes / xavier init).
# Weights stored as (Din, Dout) = torch weight transposed: y = x @ W + b.
# ---------------------------------------------------------------------------
def make_params(key, n_layers, input_dim, skip_dim, hidden_dim, input_skips):
    skips = set(input_skips)
    params = []
    for layeri in range(n_layers):
        if layeri == 0:
            dimin, dimout = input_dim, hidden_dim
        elif layeri in skips:
            dimin, dimout = hidden_dim + skip_dim, hidden_dim
        else:
            dimin, dimout = hidden_dim, hidden_dim
        key, kw, kb = jax.random.split(key, 3)
        bound_w = math.sqrt(6.0 / (dimin + dimout))   # xavier_uniform
        w = jax.random.uniform(kw, (dimin, dimout), jnp.float32,
                               minval=-bound_w, maxval=bound_w)
        bound_b = 1.0 / math.sqrt(dimin)              # torch Linear bias init
        b = jax.random.uniform(kb, (dimout,), jnp.float32,
                               minval=-bound_b, maxval=bound_b)
        params.append((w, b))
    return params


# ---------------------------------------------------------------------------
# Pack params: bf16 weights, Dout padded to 128 lanes, skip weights split,
# same-shape hidden weights stacked, biases stacked (f32).
# ---------------------------------------------------------------------------
def _pack_params(params, input_skips, input_dim, skip_dim, hidden_dim):
    skips = sorted(set(input_skips))
    h = _round_up(hidden_dim, _LANE)
    dx = _round_up(input_dim, _BF16_PACK)
    dz = _round_up(skip_dim, _BF16_PACK)

    def pad2(w, r, c):
        return jnp.pad(w, ((0, r - w.shape[0]), (0, c - w.shape[1])))

    w0 = pad2(params[0][0], dx, h).astype(jnp.bfloat16)

    whs, wzs, bs = [], [], []
    for li, (w, b) in enumerate(params):
        bs.append(jnp.pad(b, (0, h - hidden_dim))[None, :])
        if li == 0:
            continue
        if li in skips:
            whs.append(pad2(w[:hidden_dim, :], h, h))   # rows matching y
            wzs.append(pad2(w[hidden_dim:, :], dz, h))  # rows matching z
        else:
            whs.append(pad2(w, h, h))
    wstack = jnp.stack(whs).astype(jnp.bfloat16) if whs else None
    wzstack = jnp.stack(wzs).astype(jnp.bfloat16) if wzs else None
    bstack = jnp.stack(bs).astype(jnp.float32)          # (L, 1, h)
    return w0, wstack, wzstack, bstack, (dx, dz, h)


# ---------------------------------------------------------------------------
# Forward pass: one fused pallas_call over row tiles.
# ---------------------------------------------------------------------------
def mlp_with_input_skips_forward(params, x, z, input_skips, *, tile_rows=1024,
                                 interpret=False):
    n_layers = len(params)
    assert 0 not in set(input_skips), "skip at layer 0 is not supported"
    input_dim = x.shape[-1]
    skip_dim = z.shape[-1]
    hidden_dim = params[0][0].shape[1]
    skips = sorted(set(input_skips))

    lead = x.shape[:-1]
    n = math.prod(lead) if lead else 1
    out_dtype = x.dtype
    out_isize = jnp.dtype(out_dtype).itemsize

    w0, wstack, wzstack, bstack, (dx, dz, h) = _pack_params(
        params, input_skips, input_dim, skip_dim, hidden_dim)
    has_z = bool(skips)
    has_wstack = wstack is not None
    has_wz = wzstack is not None

    x2 = x.reshape(n, input_dim)
    z2 = z.reshape(n, skip_dim)
    # K dims only padded if not already bf16-pack aligned (no-op for demo dims).
    if dx != input_dim:
        x2 = jnp.pad(x2, ((0, 0), (0, dx - input_dim)))
    if has_z and dz != skip_dim:
        z2 = jnp.pad(z2, ((0, 0), (0, dz - skip_dim)))

    # ---- Row-tile sizing ---------------------------------------------------
    tr = min(tile_rows, _round_up(n, _SUBLANE))
    tr = max(_SUBLANE, _round_up(tr, _SUBLANE))
    # At least 2 row tiles so both TensorCores are used on v7x (no-op on 1-TC).
    while _round_up(n, tr) // tr < 2 and tr > _SUBLANE:
        tr = max(_SUBLANE, _round_up(tr // 2, _SUBLANE))

    # ---- VMEM budgeting ----------------------------------------------------
    try:
        vmem_cap = pltpu.get_tpu_info().vmem_capacity_bytes
    except Exception:
        vmem_cap = 64 * 1024 * 1024        # conservative (v7x per-TC)
    budget = int(vmem_cap * 0.9)

    resident = _nbytes(w0) + _nbytes(bstack)
    if has_wstack:
        resident += _nbytes(wstack)
    if has_wz:
        resident += _nbytes(wzstack)
    # TODO(synk): if packed weights alone exceed the VMEM budget (very large
    # hidden_dim on v7x's 64 MiB), fall back to an output-feature / layer tiled
    # multi-pass schedule instead of full weight residency.
    assert resident < budget, "weights alone do not fit VMEM; see TODO(synk)"

    def _tile_bytes(tr_):
        io = 2 * (tr_ * dx * x2.dtype.itemsize
                  + (tr_ * dz * z2.dtype.itemsize if has_z else 0)
                  + tr_ * h * out_isize)              # double-buffered x/z/out
        interm = 3 * tr_ * h * 4                      # f32 activation temps
        return io + interm

    while resident + _tile_bytes(tr) > budget and tr > _SUBLANE:
        tr = max(_SUBLANE, _round_up(tr // 2, _SUBLANE))

    n_pad = _round_up(n, tr)
    if n_pad != n:
        x2 = jnp.pad(x2, ((0, n_pad - n), (0, 0)))
        if has_z:
            z2 = jnp.pad(z2, ((0, n_pad - n), (0, 0)))
    grid = (n_pad // tr,)

    vmem_limit = int(min(budget,
                         max(2 * (resident + _tile_bytes(tr)),
                             32 * 1024 * 1024)))

    # ---- Specs ---------------------------------------------------------------
    def _row_spec(cols):
        return pl.BlockSpec((tr, cols), lambda i: (i, 0))

    def _resident_spec(arr):
        nd = arr.ndim
        # constant index_map + single buffer -> DMA'd once, VMEM-resident.
        return pl.BlockSpec(arr.shape, lambda i, _nd=nd: (0,) * _nd,
                            pipeline_mode=pl.Buffered(1))

    operands = [x2]
    in_specs = [_row_spec(dx)]
    if has_z:
        operands.append(z2)
        in_specs.append(_row_spec(dz))
    operands.append(w0)
    in_specs.append(_resident_spec(w0))
    if has_wstack:
        operands.append(wstack)
        in_specs.append(_resident_spec(wstack))
    if has_wz:
        operands.append(wzstack)
        in_specs.append(_resident_spec(wzstack))
    operands.append(bstack)
    in_specs.append(_resident_spec(bstack))

    # Advisory cost estimate for XLA's scheduler.
    flops = 2 * n_pad * dx * h
    flops += 2 * n_pad * h * h * max(n_layers - 1, 0)
    flops += 2 * n_pad * dz * h * len(skips)
    bytes_accessed = (_nbytes(x2) + (_nbytes(z2) if has_z else 0)
                      + resident + n_pad * h * out_isize)
    cost = pl.CostEstimate(flops=flops, transcendentals=0,
                           bytes_accessed=bytes_accessed)

    kernel = _make_fused_mlp_kernel(n_layers, skips, has_z, has_wstack, has_wz)
    out = pl.pallas_call(
        kernel,
        out_shape=jax.ShapeDtypeStruct((n_pad, h), out_dtype),
        grid_spec=pl.GridSpec(
            grid=grid,
            in_specs=in_specs,
            out_specs=pl.BlockSpec((tr, h), lambda i: (i, 0)),
        ),
        compiler_params=pltpu.CompilerParams(
            dimension_semantics=("parallel",),
            vmem_limit_bytes=vmem_limit,
        ),
        cost_estimate=cost,
        interpret=interpret,
    )(*operands)

    return out[:n, :hidden_dim].reshape(*lead, hidden_dim)


# ---------------------------------------------------------------------------
# Pure-JAX reference (f32, HIGHEST precision) for correctness checking.
# ---------------------------------------------------------------------------
def mlp_reference(params, x, z, input_skips):
    skips = set(input_skips)
    y = x
    for li, (w, b) in enumerate(params):
        if li in skips:
            y = jnp.concatenate([y, z], axis=-1)
        y = jnp.maximum(
            jnp.dot(y, w, precision=jax.lax.Precision.HIGHEST) + b, 0.0)
    return y


if __name__ == "__main__":
    # Module hyperparameters (small, but exercises the skip path).
    n_layers = 4
    input_dim = 16
    skip_dim = 16
    hidden_dim = 32
    input_skips = (2,)

    key = jax.random.PRNGKey(0)
    kp, kx, kz = jax.random.split(key, 3)
    params = make_params(kp, n_layers, input_dim, skip_dim, hidden_dim,
                         input_skips)

    # x: (batch=2, seq=8, input_dim), z: (batch=2, seq=8, skip_dim)
    x = jax.random.normal(kx, (2, 8, input_dim), jnp.float32)
    z = jax.random.normal(kz, (2, 8, skip_dim), jnp.float32)

    y = mlp_with_input_skips_forward(params, x, z, input_skips)
    y = jax.block_until_ready(y)

    y_ref = mlp_reference(params, x, z, input_skips)
    assert y.shape == (2, 8, hidden_dim)
    # bf16 MXU inputs (f32 accumulation) -> loosened tolerance vs f32 reference.
    assert jnp.allclose(y, y_ref, atol=5e-2, rtol=5e-2), \
        float(jnp.max(jnp.abs(y - y_ref)))

    print("KERNEL_OK")
</pallas_src>

<mosaic_0001>
module attributes {stable_mosaic.version = 11 : i64} {
  func.func @kernel(%arg0: i32, %arg1: memref<8x16xf32, #tpu.memory_space<vmem>>, %arg2: memref<8x16xf32, #tpu.memory_space<vmem>>, %arg3: memref<16x128xbf16, #tpu.memory_space<vmem>>, %arg4: memref<3x128x128xbf16, #tpu.memory_space<vmem>>, %arg5: memref<1x16x128xbf16, #tpu.memory_space<vmem>>, %arg6: memref<4x1x128xf32, #tpu.memory_space<vmem>>, %arg7: memref<8x128xf32, #tpu.memory_space<vmem>>) attributes {dimension_semantics = [#tpu.dimension_semantics<parallel>], iteration_bounds = array<i64: 2>, scalar_prefetch = 0 : i64, scratch_operands = 0 : i64, tpu.core_type = #tpu.core_type<tc>, window_params = [{transform_indices = @transform_0, window_bounds = array<i64: 8, 16>}, {transform_indices = @transform_1, window_bounds = array<i64: 8, 16>}, {pipeline_mode = #tpu.pipeline_mode<synchronous>, transform_indices = @transform_2, window_bounds = array<i64: 16, 128>}, {pipeline_mode = #tpu.pipeline_mode<synchronous>, transform_indices = @transform_3, window_bounds = array<i64: 3, 128, 128>}, {pipeline_mode = #tpu.pipeline_mode<synchronous>, transform_indices = @transform_4, window_bounds = array<i64: 1, 16, 128>}, {pipeline_mode = #tpu.pipeline_mode<synchronous>, transform_indices = @transform_5, window_bounds = array<i64: 4, 1, 128>}, {transform_indices = @transform_6, window_bounds = array<i64: 8, 128>}]} {
    %c0 = arith.constant 0 : index
    %c0_0 = arith.constant 0 : index
    %0 = vector.load %arg1[%c0, %c0_0] : memref<8x16xf32, #tpu.memory_space<vmem>>, vector<8x16xf32>
    %1 = arith.truncf %0 : vector<8x16xf32> to vector<8x16xbf16>
    %c0_1 = arith.constant 0 : index
    %c0_2 = arith.constant 0 : index
    %2 = vector.load %arg2[%c0_1, %c0_2] : memref<8x16xf32, #tpu.memory_space<vmem>>, vector<8x16xf32>
    %3 = arith.truncf %2 : vector<8x16xf32> to vector<8x16xbf16>
    %c0_3 = arith.constant 0 : index
    %c0_4 = arith.constant 0 : index
    %4 = vector.load %arg3[%c0_3, %c0_4] : memref<16x128xbf16, #tpu.memory_space<vmem>>, vector<16x128xbf16>
    %cst = arith.constant dense<0.000000e+00> : vector<8x128xf32>
    %5 = tpu.matmul %1, %4, %cst {dimension_numbers = #tpu.dot_dimension_numbers<[1], [0], [0], [1], [0, 0, 1, 1], [], []>} : vector<8x16xbf16>, vector<16x128xbf16>, vector<8x128xf32> -> vector<8x128xf32>
    %c0_5 = arith.constant 0 : index
    %c0_6 = arith.constant 0 : index
    %c0_7 = arith.constant 0 : index
    %6 = vector.load %arg6[%c0_5, %c0_6, %c0_7] : memref<4x1x128xf32, #tpu.memory_space<vmem>>, vector<1x1x128xf32>
    %7 = vector.shape_cast %6 : vector<1x1x128xf32> to vector<1x128xf32>
    %8 = vector.broadcast %7 : vector<1x128xf32> to vector<8x128xf32>
    %9 = arith.addf %5, %8 : vector<8x128xf32>
    %cst_8 = arith.constant 0.000000e+00 : f32
    %10 = vector.broadcast %cst_8 : f32 to vector<8x128xf32>
    %11 = arith.maximumf %9, %10 : vector<8x128xf32>
    %12 = arith.truncf %11 : vector<8x128xf32> to vector<8x128xbf16>
    %c0_9 = arith.constant 0 : index
    %c0_10 = arith.constant 0 : index
    %c0_11 = arith.constant 0 : index
    %13 = vector.load %arg4[%c0_9, %c0_10, %c0_11] : memref<3x128x128xbf16, #tpu.memory_space<vmem>>, vector<1x128x128xbf16>
    %14 = vector.shape_cast %13 : vector<1x128x128xbf16> to vector<128x128xbf16>
    %cst_12 = arith.constant dense<0.000000e+00> : vector<8x128xf32>
    %15 = tpu.matmul %12, %14, %cst_12 {dimension_numbers = #tpu.dot_dimension_numbers<[1], [0], [0], [1], [0, 0, 1, 1], [], []>} : vector<8x128xbf16>, vector<128x128xbf16>, vector<8x128xf32> -> vector<8x128xf32>
    %c1 = arith.constant 1 : index
    %c0_13 = arith.constant 0 : index
    %c0_14 = arith.constant 0 : index
    %16 = vector.load %arg6[%c1, %c0_13, %c0_14] : memref<4x1x128xf32, #tpu.memory_space<vmem>>, vector<1x1x128xf32>
    %17 = vector.shape_cast %16 : vector<1x1x128xf32> to vector<1x128xf32>
    %18 = vector.broadcast %17 : vector<1x128xf32> to vector<8x128xf32>
    %19 = arith.addf %15, %18 : vector<8x128xf32>
    %cst_15 = arith.constant 0.000000e+00 : f32
    %20 = vector.broadcast %cst_15 : f32 to vector<8x128xf32>
    %21 = arith.maximumf %19, %20 : vector<8x128xf32>
    %22 = arith.truncf %21 : vector<8x128xf32> to vector<8x128xbf16>
    %c1_16 = arith.constant 1 : index
    %c0_17 = arith.constant 0 : index
    %c0_18 = arith.constant 0 : index
    %23 = vector.load %arg4[%c1_16, %c0_17, %c0_18] : memref<3x128x128xbf16, #tpu.memory_space<vmem>>, vector<1x128x128xbf16>
    %24 = vector.shape_cast %23 : vector<1x128x128xbf16> to vector<128x128xbf16>
    %cst_19 = arith.constant dense<0.000000e+00> : vector<8x128xf32>
    %25 = tpu.matmul %22, %24, %cst_19 {dimension_numbers = #tpu.dot_dimension_numbers<[1], [0], [0], [1], [0, 0, 1, 1], [], []>} : vector<8x128xbf16>, vector<128x128xbf16>, vector<8x128xf32> -> vector<8x128xf32>
    %c0_20 = arith.constant 0 : index
    %c0_21 = arith.constant 0 : index
    %c0_22 = arith.constant 0 : index
    %26 = vector.load %arg5[%c0_20, %c0_21, %c0_22] : memref<1x16x128xbf16, #tpu.memory_space<vmem>>, vector<1x16x128xbf16>
    %27 = vector.shape_cast %26 : vector<1x16x128xbf16> to vector<16x128xbf16>
    %cst_23 = arith.constant dense<0.000000e+00> : vector<8x128xf32>
    %28 = tpu.matmul %3, %27, %cst_23 {dimension_numbers = #tpu.dot_dimension_numbers<[1], [0], [0], [1], [0, 0, 1, 1], [], []>} : vector<8x16xbf16>, vector<16x128xbf16>, vector<8x128xf32> -> vector<8x128xf32>
    %29 = arith.addf %25, %28 : vector<8x128xf32>
    %c2 = arith.constant 2 : index
    %c0_24 = arith.constant 0 : index
    %c0_25 = arith.constant 0 : index
    %30 = vector.load %arg6[%c2, %c0_24, %c0_25] : memref<4x1x128xf32, #tpu.memory_space<vmem>>, vector<1x1x128xf32>
    %31 = vector.shape_cast %30 : vector<1x1x128xf32> to vector<1x128xf32>
    %32 = vector.broadcast %31 : vector<1x128xf32> to vector<8x128xf32>
    %33 = arith.addf %29, %32 : vector<8x128xf32>
    %cst_26 = arith.constant 0.000000e+00 : f32
    %34 = vector.broadcast %cst_26 : f32 to vector<8x128xf32>
    %35 = arith.maximumf %33, %34 : vector<8x128xf32>
    %36 = arith.truncf %35 : vector<8x128xf32> to vector<8x128xbf16>
    %c2_27 = arith.constant 2 : index
    %c0_28 = arith.constant 0 : index
    %c0_29 = arith.constant 0 : index
    %37 = vector.load %arg4[%c2_27, %c0_28, %c0_29] : memref<3x128x128xbf16, #tpu.memory_space<vmem>>, vector<1x128x128xbf16>
    %38 = vector.shape_cast %37 : vector<1x128x128xbf16> to vector<128x128xbf16>
    %cst_30 = arith.constant dense<0.000000e+00> : vector<8x128xf32>
    %39 = tpu.matmul %36, %38, %cst_30 {dimension_numbers = #tpu.dot_dimension_numbers<[1], [0], [0], [1], [0, 0, 1, 1], [], []>} : vector<8x128xbf16>, vector<128x128xbf16>, vector<8x128xf32> -> vector<8x128xf32>
    %c3 = arith.constant 3 : index
    %c0_31 = arith.constant 0 : index
    %c0_32 = arith.constant 0 : index
    %40 = vector.load %arg6[%c3, %c0_31, %c0_32] : memref<4x1x128xf32, #tpu.memory_space<vmem>>, vector<1x1x128xf32>
    %41 = vector.shape_cast %40 : vector<1x1x128xf32> to vector<1x128xf32>
    %42 = vector.broadcast %41 : vector<1x128xf32> to vector<8x128xf32>
    %43 = arith.addf %39, %42 : vector<8x128xf32>
    %cst_33 = arith.constant 0.000000e+00 : f32
    %44 = vector.broadcast %cst_33 : f32 to vector<8x128xf32>
    %45 = arith.maximumf %43, %44 : vector<8x128xf32>
    %c0_34 = arith.constant 0 : index
    %c0_35 = arith.constant 0 : index
    %46 = vector.load %arg7[%c0_34, %c0_35] : memref<8x128xf32, #tpu.memory_space<vmem>>, vector<8x128xf32>
    tpu.vector_store %arg7[%c0_34, %c0_35], %45 {strides = array<i32>} : memref<8x128xf32, #tpu.memory_space<vmem>>, vector<8x128xf32>,
    return
  }
  func.func @transform_0(%arg0: i32) -> (i32, i32) {
    %c0_i32 = arith.constant 0 : i32
    %c0_i32_0 = arith.constant 0 : i32
    return %arg0, %c0_i32 : i32, i32
  }
  func.func @transform_1(%arg0: i32) -> (i32, i32) {
    %c0_i32 = arith.constant 0 : i32
    %c0_i32_0 = arith.constant 0 : i32
    return %arg0, %c0_i32 : i32, i32
  }
  func.func @transform_2(%arg0: i32) -> (i32, i32) {
    %c0_i32 = arith.constant 0 : i32
    %c0_i32_0 = arith.constant 0 : i32
    %c0_i32_1 = arith.constant 0 : i32
    return %c0_i32, %c0_i32_0 : i32, i32
  }
  func.func @transform_3(%arg0: i32) -> (i32, i32, i32) {
    %c0_i32 = arith.constant 0 : i32
    %c0_i32_0 = arith.constant 0 : i32
    %c0_i32_1 = arith.constant 0 : i32
    %c0_i32_2 = arith.constant 0 : i32
    return %c0_i32, %c0_i32_0, %c0_i32_1 : i32, i32, i32
  }
  func.func @transform_4(%arg0: i32) -> (i32, i32, i32) {
    %c0_i32 = arith.constant 0 : i32
    %c0_i32_0 = arith.constant 0 : i32
    %c0_i32_1 = arith.constant 0 : i32
    %c0_i32_2 = arith.constant 0 : i32
    return %c0_i32, %c0_i32_0, %c0_i32_1 : i32, i32, i32
  }
  func.func @transform_5(%arg0: i32) -> (i32, i32, i32) {
    %c0_i32 = arith.constant 0 : i32
    %c0_i32_0 = arith.constant 0 : i32
    %c0_i32_1 = arith.constant 0 : i32
    %c0_i32_2 = arith.constant 0 : i32
    return %c0_i32, %c0_i32_0, %c0_i32_1 : i32, i32, i32
  }
  func.func @transform_6(%arg0: i32) -> (i32, i32) {
    %c0_i32 = arith.constant 0 : i32
    %c0_i32_0 = arith.constant 0 : i32
    return %arg0, %c0_i32 : i32, i32
  }
}

</mosaic_0001>

<bundles_post_ra>
// kernel: tpu_custom_call.1
= control target key start
LH: loop header
LB: loop body
LE: loop exit
PB: predicated region body
PF: predicated region fallthrough
CT: control target
= control target key end

     0   :  { %s1529_s0 = inlined_call_operand.hbm [shape: f32[16,16], index: 0, kind: input, shape index: {}]   ;;  %s1530_s1 = inlined_call_operand.hbm [shape: f32[16,16], index: 1, kind: input, shape index: {}]   ;;  %s1531_s2 = inlined_call_operand.hbm [shape: bf16[16,128], index: 2, kind: input, shape index: {}]   ;;  %s1532_s3 = inlined_call_operand.hbm [shape: bf16[3,128,128], index: 3, kind: input, shape index: {}]   ;;  %s1533_s4 = inlined_call_operand.hbm [shape: bf16[1,16,128], index: 4, kind: input, shape index: {}]   ;;  %s1534_s5 = inlined_call_operand.vmem [shape: f32[4,1,128], index: 5, kind: input, shape index: {}]   ;;  %s1535_s6 = inlined_call_operand.hbm [shape: f32[16,128], index: 6, kind: output, shape index: {}]  }
   0x1   :  { %1537 = sst [smem:[#allocation19_spill]] %s1531_s2 }
   0x2   :  { %1538 = sst [smem:[#allocation20_spill]] %s1532_s3 }
   0x3   :  { %1539 = sst [smem:[#allocation21_spill]] %s1533_s4 }
   0x4   :  { %11 = vsyncpa [#allocation3], 0 }
   0x5   :  { %13 = vsyncpa [#allocation3 + $0x1], 0 }
   0x6   :  { %14 = vsyncpa [#allocation6], 0 }
   0x7   :  { %16 = vsyncpa [#allocation6 + $0x1], 0 }
   0x8   :  { %17 = vsyncpa [#allocation9], 0 }
   0x9   :  { %18 = vsyncpa [#allocation4], 0 }
   0xa   :  { %20 = vsyncpa [#allocation4 + $0x1], 0  ;;  %s1323_s21 = smov 0   ;;  %s1325_s22 = smov 0  }
   0xb   :  { %s1327_s23 = smov 0   ;;  %s1329_s24 = smov 0  }
   0xc LB: > { %1540 = sst [smem:[#allocation17_spill]] %s1277_s23  ;;  %s1347_s28 = sadd.s32 4294967295, %s1281_s24   ;;  %s1281_s24 = sphi %s1329_s24, %s1557_s24   ;;  %s1277_s23 = sphi %s1327_s23, %s1554_s23   ;;  %s1273_s22 = sphi %s1325_s22, %s1556_s22   ;;  %s1269_s21 = sphi %s1323_s21, %s1555_s21  }
   0xd   : > { %s1541_s2 = sld [smem:[#allocation19_spill]]  ;;  %p810_p0 = scmp.ge.s32.totalorder %s1281_s24, 1 }
   0xe   : > { %p47_p1 = scmp.eq.s32.totalorder %s1347_s28, 0  ;;  %p193_p2 = scmp.lt.s32.totalorder %s1281_s24, 3 }
   0xf   : > { %s1283_s30 = smov [#allocation7]   ;;  %s1543_s3 = sld [smem:[#allocation20_spill]] }
  0x10   : > { %p1352_p3 = pnand %p810_p0, %p193_p2  ;;  %s206_s7 = sshll.u32 %s1283_s30, 4  ;;  %s207_s7 = int_to_ptr.vmem [resolvable:$true] %s206_s7 }
  0x11   : > { %s1545_s4 = sld [smem:[#allocation21_spill]]  ;;  %s1284_s15 = smov [#allocation8]  }
  0x12   : > { %p983_p4 = pneg %p1352_p3  ;;  %s220_s16 = sshll.u32 %s1284_s15, 4  ;;  %s221_s16 = int_to_ptr.vmem [resolvable:$true] %s220_s16 }
  0x13   : > { %s204_s27 = sshll.u32 %s1541_s2, 4  ;;  %s1285_s17 = smov 64   ;;  %s205_s27 = int_to_ptr.hbm [resolvable:$true] %s204_s27 }
  0x14   : > { %p1364_p6 = pnand %p983_p4, %p47_p1  ;;  %s1286_s18 = smov 4  }
  0x15   : > { %s218_s10 = sshll.u32 %s1543_s3, 4  ;;  %s1287_s19 = smov [#allocation10]   ;;  %s219_s10 = int_to_ptr.hbm [resolvable:$true] %s218_s10 }
  0x16   : > { %986 = dma.hbm_to_vmem [thread:$0]  (!%p1364_p6), %s205_s27, 128, %s207_s7, [#allocation6], %s1285_s17, %s1285_s17, %s1286_s18  }
  0x17   : > { %s232_s14 = sshll.u32 %s1545_s4, 4  ;;  %s234_s20 = sshll.u32 %s1287_s19, 4  ;;  %s233_s14 = int_to_ptr.hbm [resolvable:$true] %s232_s14  ;;  %s235_s20 = int_to_ptr.vmem [resolvable:$true] %s234_s20 }
  0x18   : > { %989 = dma.hbm_to_vmem [thread:$0]  (!%p1364_p6), %s219_s10, 3072, %s221_s16, [#allocation9], %s1285_s17, %s1285_s17, %s1286_s18  }
  0x19   : > { %992 = dma.hbm_to_vmem [thread:$0]  (!%p1364_p6), %s233_s14, 128, %s235_s20, [#allocation9], %s1285_s17, %s1285_s17, %s1286_s18  }
  0x1a   : > { %s809_s25 = sadd.s32 4294967294, %s1281_s24   ;;  %s1379_s26 = sadd.s32 1, %s1281_s24  }
  0x1b   : > { %s33_s30 = sadd.s32 1, %s1277_s23  ;;  %s30_s27 = ssub.s32 %s1281_s24, %s1379_s26 }
  0x1c   : > { %p40_p7 = scmp.ne.s32.totalorder %s1277_s23, %s1273_s22  ;;  %p31_p8 = scmp.eq.s32.totalorder %s30_s27, 0 }
  0x1d   : > { %p41_p9 = scmp.eq.s32.totalorder %s1281_s24, 0  ;;  %p46_p10 = scmp.ne.s32.totalorder %s1273_s22, %s1269_s21 }
  0x1e   : > { %p180_p11 = scmp.eq.s32.totalorder %s1347_s28, 1  ;;  %p186_p2 = scmp.eq.s32.totalorder %s809_s25, 1 }
  0x1f   : > { %s1391_s7 = scalar_select %p31_p8, %s1277_s23, %s33_s30  }
  0x20   : > { %p1393_p12 = por %p41_p9, %p40_p7  ;;  %p1399_p13 = por %p47_p1, %p46_p10 }
  0x21   : > { %1546 = sst [smem:[#allocation18_spill]] %s1391_s7  ;;  %p1403_p0 = por %p180_p11, %p40_p7 }
  0x22   : > { %p1007_p4 = scmp.lt.s32.totalorder %s1281_s24, 2  ;;  %s251_s11 = sand.u32 1, %s1277_s23  }
  0x23   : > { %p1409_p6 = por %p186_p2, %p46_p10  ;;  %s815_s13 = sshll.u32 %s251_s11, 3 }
  0x24   : > { %s816_s14 = sshll.u32 %s1281_s24, 3  ;;  %s255_s19 = scalar_lea.vmem [#allocation2], %s815_s13 }
  0x25   : > { %s259_s17 = scalar_lea.hbm %s1529_s0, %s816_s14  ;;  %s263_s20 = sshll.u32 %s255_s19, 4  ;;  %s264_s20 = int_to_ptr.vmem [resolvable:$true] %s263_s20 }
  0x26   : > { %s261_s18 = sshll.u32 %s259_s17, 4  ;;  %p1419_p7 = pnand %p1007_p4, %p1393_p12  ;;  %s262_s18 = int_to_ptr.hbm [resolvable:$true] %s261_s18 }
  0x27   : > { %s278_s2 = scalar_lea.hbm %s1530_s1, %s816_s14  ;;  %s270_s3 = sand.u32 1, %s1281_s24  }
  0x28   : > { %s252_s4 = scalar_lea.sflag [#allocation3], %s251_s11  ;;  %s1143_s15 = sshra.s32 %s262_s18, 4  ;;  %s1144_s15 = int_to_ptr.hbm [resolvable:$true] %s1143_s15 }
  0x29   : > { %s1145_s16 = scalar_lea.hbm %s1144_s15, 8  ;;  %p1147_p9 = pneg %p1419_p7 }
  0x2a   : > { %p1146_p8 = scmp.ne.s32.totalorder %s1144_s15, %s1145_s16  ;;  %s1150_s19 = scalar_lea.hbm %s1529_s0, 16 }
  0x2b   : > { %p1151_p12 = scmp.lt.s32.totalorder %s1144_s15, %s1529_s0  ;;  %p1152_p2 = scmp.lt.s32.totalorder %s1150_s19, %s1145_s16 }
  0x2c   : > { %p1148_p10 = pnand %p1147_p9, %p1146_p8 }
  0x2d   : > { %p1153_p4 = por %p1152_p2, %p1151_p12 }
  0x2e   : > { %p1149_p11 = pneg %p1148_p10 }
  0x30   : > { %p1154_p5 = pnand %p1153_p4, %p1149_p11 }
  0x32   : > { %1157 = shalt.err (!%p1154_p5)
}
  0x33   : > { %996 = dma.hbm_to_vmem [thread:$0]  (!%p1419_p7), %s262_s18, 128, %s264_s20, %s252_s4  }
  0x34   : > { %s280_s11 = sshll.u32 %s278_s2, 4  ;;  %s274_s14 = scalar_lea.vmem [#allocation5], %s815_s13  ;;  %s281_s11 = int_to_ptr.hbm [resolvable:$true] %s280_s11 }
  0x35   : > { %s282_s7 = sshll.u32 %s274_s14, 4  ;;  %s271_s23 = scalar_lea.sflag [#allocation6], %s270_s3  ;;  %s283_s7 = int_to_ptr.vmem [resolvable:$true] %s282_s7 }
  0x36   : > { %s1173_s8 = sshra.s32 %s281_s11, 4  ;;  %s1180_s19 = scalar_lea.hbm %s1530_s1, 16  ;;  %s1174_s8 = int_to_ptr.hbm [resolvable:$true] %s1173_s8 }
  0x37   : > { %s1175_s17 = scalar_lea.hbm %s1174_s8, 8  ;;  %p1181_p5 = scmp.lt.s32.totalorder %s1174_s8, %s1530_s1 }
  0x38   : > { %p1176_p8 = scmp.ne.s32.totalorder %s1174_s8, %s1175_s17  ;;  %p1182_p11 = scmp.lt.s32.totalorder %s1180_s19, %s1175_s17 }
  0x3a   : > { %p1178_p10 = pnand %p1176_p8, %p1147_p9  ;;  %p1183_p2 = por %p1182_p11, %p1181_p5 }
  0x3c   : > { %p1179_p12 = pneg %p1178_p10 }
  0x3e   : > { %p1184_p4 = pnand %p1183_p2, %p1179_p12 }
  0x40   : > { %1187 = shalt.err (!%p1184_p4)
}
  0x41   : > { %999 = dma.hbm_to_vmem [thread:$0]  (!%p1419_p7), %s281_s11, 128, %s283_s7, %s271_s23  }
  0x42   : > { %291 = sbr.rel (%p1352_p3) target bundleno = 627 (0x273), region = 44  ;;  %s1454_s2 = sand.u32 (!%p1352_p3), 1, %s1273_s22  }
  0x43   : > { %s1457_s3 = sshll.u32 (!%p1352_p3), %s1454_s2, 3  ;;  %s294_s13 = scalar_lea.sflag (!%p1352_p3), [#allocation3], %s1454_s2 }
  0x44   : > { %s297_s18 = scalar_lea.vmem (!%p1352_p3), [#allocation2], %s1457_s3 }
  0x47   : > { %1248 = dma.done.wait (%p1399_p13), %s294_s13, 128  }
  0x48   : > { %1250 = vsyncadd (%p1399_p13), %s294_s13, 4294967168  ;;  %s303_s23 = sand.u32 1, %s1347_s28   ;;  %s307_s7 = scalar_lea.vmem [#allocation5], %s1457_s3 }
  0x49   : > { %s304_s29 = scalar_lea.sflag [#allocation6], %s303_s23 }
  0x4a   : > { %1252 = dma.done.wait (%p1399_p13), %s304_s29, 128  }
  0x4b   : > { %1254 = vsyncadd (%p1399_p13), %s304_s29, 4294967168 }
  0x4c   : > { %1256 = dma.done.wait (%p47_p1), [#allocation6], 128  }
  0x4d   : > { %1258 = vsyncadd (%p47_p1), [#allocation6], 4294967168 }
  0x4e   : > { %1260 = dma.done.wait (%p47_p1), [#allocation9], 3200  }
  0x4f   : > { %1262 = vsyncadd (%p47_p1), [#allocation9], 4294964096  ;;  %v939_v0 = vld [vmem:[#allocation7] sm:$0xff]  ;;  %vm374_vm0 = vcmask 130048   ;;  %v946_v4 = vld [vmem:[#allocation8 + $0x30] sm:$0xff]  ;;  %s936_s8 = sshll.u32 %s1347_s28, 3 }
  0x50   : > { %v358_v1 = vld [vmem:[%s297_s18] sm:$0xff]  ;;  %385 = vmatpush.bf16.msra.mxu2 %v939_v0  ;;  %v945_v5 = vld [vmem:[#allocation8 + $0x28] sm:$0xff]  ;;  %v942_v8 = vld [vmem:[#allocation8 + $0x10] sm:$0xff]  ;;  %s683_s30 = scalar_lea.hbm %s1535_s6, %s936_s8  ;;  %s356_s4 = scalar_lea.vmem [#allocation11], %s1457_s3 }
  0x51   : > { %v947_v2 = vld [vmem:[#allocation8 + $0x38] sm:$0xff]  ;;  %v359_v3 = vpack.c.bf16 %v358_v1, %v358_v1  ;;  %v944_v6 = vld [vmem:[#allocation8 + $0x20] sm:$0xff]  ;;  %v941_v9 = vld [vmem:[#allocation8 + $0x8] sm:$0xff]  ;;  %s685_s13 = sshll.u32 %s356_s4, 4  ;;  %s687_s18 = sshll.u32 %s683_s30, 4  ;;  %s686_s13 = int_to_ptr.vmem [resolvable:$true] %s685_s13  ;;  %s688_s18 = int_to_ptr.hbm [resolvable:$true] %s687_s18 }
  0x52   : > { %462 = vmatpush.bf16.msra.mxu1 %v947_v2  ;;  %v943_v7 = vld [vmem:[#allocation8 + $0x18] sm:$0xff]  ;;  %v940_v10 = vld [vmem:[#allocation8] sm:$0xff]  ;;  %v954_v13 = vld [vmem:[#allocation8 + $0x70] sm:$0xff]  ;;  %s673_s23 = scalar_lea.sflag [#allocation4], %s1454_s2  ;;  %s1217_s28 = sshra.s32 %s688_s18, 4  ;;  %s1218_s28 = int_to_ptr.hbm [resolvable:$true] %s1217_s28 }
  0x53   : > { %830 = vmatmul.msk.bf16.vlgmr.msra.gmra.mxu2 %vm374_vm0, %v359_v3  ;;  %v955_v11 = vld [vmem:[#allocation8 + $0x78] sm:$0xff]  ;;  %v956_v12 = vld [vmem:[#allocation10] sm:$0xff]  ;;  %v360_v14 = vld [vmem:[%s307_s7] sm:$0xff]  ;;  %s1219_s29 = scalar_lea.hbm %s1218_s28, 8  ;;  %s1223_s20 = scalar_lea.hbm %s1535_s6, 16 }
  0x54   : > { %566 = vmatpush.bf16.msra.mxu3 %v955_v11  ;;  %512 = vmatpush.bf16.msrb.mxu2 %v956_v12  ;;  %v361_v15 = vpack.c.bf16 %v360_v14, %v360_v14  ;;  %v953_v16 = vld [vmem:[#allocation8 + $0x68] sm:$0xff]  ;;  %v952_v17 = vld [vmem:[#allocation8 + $0x60] sm:$0xff]  ;;  %v951_v18 = vld [vmem:[#allocation8 + $0x58] sm:$0xff]  ;;  %p1220_p1 = scmp.ne.s32.totalorder %s1218_s28, %s1219_s29  ;;  %p1224_p7 = scmp.lt.s32.totalorder %s1218_s28, %s1535_s6 }
  0x55   : > { %v950_v19 = vld [vmem:[#allocation8 + $0x50] sm:$0xff]  ;;  %v1049_v20 = vld [vmem:[%s1534_s5] ss:$0 sm:$0xff]  ;;  %v949_v26 = vld [vmem:[#allocation8 + $0x48] sm:$0xff]  ;;  %p1225_p9 = scmp.lt.s32.totalorder %s1223_s20, %s1219_s29 }
  0x56   : > { %463 = vmatpush.bf16.msra.mxu1 %v946_v4  ;;  %v948_v27 = vld [vmem:[#allocation8 + $0x40] sm:$0xff]  ;;  %v964_v28 = vld [vmem:[#allocation8 + $0xb8] sm:$0xff]  ;;  %v963_v29 = vld [vmem:[#allocation8 + $0xb0] sm:$0xff]  ;;  %p1221_p3 = pnand %p1220_p1, %p1403_p0 }
  0x57   : > { %657 = vmatpush.bf16.msra.mxu0 %v964_v28  ;;  %v962_v31 = vld [vmem:[#allocation8 + $0xa8] sm:$0xff]  ;;  %v961_v32 = vld [vmem:[#allocation8 + $0xa0] sm:$0xff]  ;;  %v960_v34 = vld [vmem:[#allocation8 + $0x98] sm:$0xff]  ;;  %p1226_p8 = por %p1225_p9, %p1224_p7 }
  0x58   : > { %567 = vmatpush.bf16.msra.mxu3 %v954_v13  ;;  %v959_v35 = vld [vmem:[#allocation8 + $0x90] sm:$0xff]  ;;  %v1050_v36 = vld [vmem:[%s1534_s5 + $0x1] ss:$0 sm:$0xff]  ;;  %v958_v42 = vld [vmem:[#allocation8 + $0x88] sm:$0xff]  ;;  %p1222_p13 = pneg %p1221_p3 }
  0x59   : > { %v957_v43 = vld [vmem:[#allocation8 + $0x80] sm:$0xff]  ;;  %v1051_v44 = vld [vmem:[%s1534_s5 + $0x2] ss:$0 sm:$0xff]  ;;  %v1052_v51 = vld [vmem:[%s1534_s5 + $0x3] ss:$0 sm:$0xff] }
  0x5a   : > { %464 = vmatpush.bf16.msra.mxu1 %v945_v5  ;;  %p1227_p10 = pnand %p1226_p8, %p1222_p13 }
  0x5b   : > { %658 = vmatpush.bf16.msra.mxu0 %v963_v29 }
  0x5c   : > { %568 = vmatpush.bf16.msra.mxu3 %v953_v16 }
  0x5e   : > { %465 = vmatpush.bf16.msra.mxu1 %v944_v6 }
  0x5f   : > { %659 = vmatpush.bf16.msra.mxu0 %v962_v31 }
  0x60   : > { %569 = vmatpush.bf16.msra.mxu3 %v952_v17 }
  0x62   : > { %466 = vmatpush.bf16.msra.mxu1 %v943_v7 }
  0x63   : > { %868 = vmatmul.msk.bf16.vlgmr.msrb.gmra.mxu2 %vm374_vm0, %v361_v15  ;;  %660 = vmatpush.bf16.msra.mxu0 %v961_v32 }
  0x64   : > { %570 = vmatpush.bf16.msra.mxu3 %v951_v18 }
  0x66   : > { %467 = vmatpush.bf16.msra.mxu1 %v942_v8 }
  0x67   : > { %661 = vmatpush.bf16.msra.mxu0 %v960_v34 }
  0x68   : > { %571 = vmatpush.bf16.msra.mxu3 %v950_v19 }
  0x6a   : > { %468 = vmatpush.bf16.msra.mxu1 %v941_v9 }
  0x6b   : > { %662 = vmatpush.bf16.msra.mxu0 %v959_v35 }
  0x6c   : > { %572 = vmatpush.bf16.msra.mxu3 %v949_v26 }
  0x6e   : > { %469 = vmatpush.bf16.msra.mxu1 %v940_v10 }
  0x6f   : > { %663 = vmatpush.bf16.msra.mxu0 %v958_v42 }
  0x70   : > { %573 = vmatpush.bf16.msra.mxu3 %v948_v27 }
  0x73   : > { %664 = vmatpush.bf16.msra.mxu0 %v957_v43 }
  0xd6   : > { %v387_v21 = vpop.f32.mrf.mxu2 }
  0xd7   : > { %v388_v22 = vadd.f32 %v1049_v20, %v387_v21 }
  0xd9   : > { %v391_v23 = vmax.f32 %v388_v22, 0.0 }
  0xdb   : > { %v392_v24 = vpack.c.bf16 %v391_v23, %v391_v23 }
  0xdd   : > { %470 = vmatmul.bf16.vlgmr.msra.gmra.mxu1 %v392_v24 }
  0xde   : > { %v389_v25 = vpop.f32.mrf.mxu2 }
  0xe6   : > { %v514_v30 = vpop.f32.mrf.mxu2 }
  0xee   : > { %v516_v33 = vpop.f32.mrf.mxu2 }
 0x15a   : > { %v471_v37 = vpop.f32.mrf.mxu1 }
 0x15b   : > { %v472_v38 = vadd.f32 %v1050_v36, %v471_v37 }
 0x15d   : > { %v475_v39 = vmax.f32 %v472_v38, 0.0 }
 0x15f   : > { %v476_v40 = vpack.c.bf16 %v475_v39, %v475_v39 }
 0x161   : > { %574 = vmatmul.bf16.vlgmr.msra.gmra.mxu3 %v476_v40 }
 0x162   : > { %v473_v41 = vpop.f32.mrf.mxu1 }
 0x1e4   : > { %v575_v45 = vpop.f32.mrf.mxu3 }
 0x1e5   : > { %v576_v46 = vadd.f32 %v575_v45, %v514_v30 }
 0x1e7   : > { %v584_v47 = vadd.f32 %v1051_v44, %v576_v46 }
 0x1e9   : > { %v585_v48 = vmax.f32 %v584_v47, 0.0 }
 0x1eb   : > { %v586_v49 = vpack.c.bf16 %v585_v48, %v585_v48 }
 0x1ec   : > { %v577_v50 = vpop.f32.mrf.mxu3 }
 0x1ed   : > { %665 = vmatmul.bf16.vlgmr.msra.gmra.mxu0 %v586_v49 }
 0x26a   : > { %v666_v52 = vpop.f32.mrf.mxu0 }
 0x26b   : > { %v667_v53 = vadd.f32 %v1052_v51, %v666_v52 }
 0x26d   : > { %v670_v54 = vmax.f32 %v667_v53, 0.0 }
 0x26f   : > { %671 = vst [vmem:[%s356_s4] sm:$0xff] %v670_v54 }
 0x270   : > { %1230 = shalt.err (!%p1227_p10)
}
 0x271   : > { %981 = dma.vmem_to_hbm [thread:$0]  (%p1403_p0), %s686_s13, 128, %s688_s18, %s673_s23  }
 0x272   : > { %v668_v55 = vpop.f32.mrf.mxu0 }
 0x273 PF: > { %s699_s2 = sand.u32 1, %s1269_s21   ;;  %p1552_p12 = scmp.ge.s32.totalorder %s1281_s24, 2 }
 0x274   : > { %s700_s27 = scalar_lea.sflag [#allocation4], %s699_s2 }
 0x275   : > { %p1001_p5 = pnand %p1552_p12, %p1409_p6 }
 0x277   : > { %p1002_p11 = pneg %p1001_p5 }
 0x279   : > { %1264 = dma.done.wait (%p1002_p11), %s700_s27, 128  }
 0x27a   : > { %1266 = vsyncadd (%p1002_p11), %s700_s27, 4294967168  ;;  %s1553_s11 = sld [smem:[#allocation17_spill]]  ;;  %p23_p2 = scmp.ge.s32.totalorder %s1379_s26, 4  }
 0x27b   : > { %s1554_s23 = sld [smem:[#allocation18_spill]]  ;;  %s1555_s21 = smov %s1273_s22 }
 0x27c   : > { %s1557_s24 = smov %s1379_s26  ;;  %25 = sbr.rel (!%p23_p2) target bundleno = 12 (0xc), region = 119 }
 0x280   : > { %s1556_s22 = smov %s1553_s11 }
 0x281   :  { %706 = vsyncpa [#allocation3], 1 }
 0x282   :  { %708 = vsyncpa [#allocation3 + $0x1], 1 }
 0x283   :  { %709 = vsyncpa [#allocation6], 1 }
 0x284   :  { %711 = vsyncpa [#allocation6 + $0x1], 1 }
 0x285   :  { %712 = vsyncpa [#allocation9], 1 }
 0x286   :  { %713 = vsyncpa [#allocation4], 1 }
 0x287   :  { %715 = vsyncpa [#allocation4 + $0x1], 1 }

</bundles_post_ra>
